<compile_context>
chip_gen: v6e
topology: v6e:2x2x1
jax: 0.10.0
libtpu: 0.0.40
codegen_flags: <defaults>
</compile_context>

<pallas_src>
import functools

import jax
import jax.numpy as jnp
import numpy as np
from jax.experimental import pallas as pl
from jax.experimental.pallas import tpu as pltpu

# Live taps of the 'B'-masked 3x3 kernel; (1,2) and all of row 2 are zeroed.
_LIVE_TAPS = ((0, 0), (0, 1), (0, 2), (1, 0), (1, 1))


def _round_up(x, m):
    return (x + m - 1) // m * m


def _residual_masked_conv_kernel(x_ref, p_ref, out_ref, *,
                                 C, Cmid, W, S, off_m, off_w1, off_w2, off_w3):
    """One batch element per grid step.

    x_ref/out_ref: (1, C, HW)   channels on sublanes, flat spatial on lanes.
    p_ref:         (R, >=HW)    packed param slab (masks + weights + biases).
    """
    HW = x_ref.shape[2]
    x = x_ref[0]                                                  # (C, HW)

    # conv1: 1x1 ('B' mask is identity for k=1) + bias + ReLU.
    w1 = p_ref[off_w1:off_w1 + Cmid, 0:C]                         # (Cmid, C)
    b1 = p_ref[off_w1:off_w1 + Cmid, C:C + 1]                     # (Cmid, 1)
    h1 = jnp.dot(w1, x, preferred_element_type=jnp.float32) + b1
    h1 = jnp.maximum(h1, 0.0)                                     # (Cmid, HW)

    # conv2: 'B'-masked 3x3, pad=1 -> 5 live taps, per-tap accumulating dots.
    # Center tap (1,1): no shift, always valid.
    w2c = p_ref[off_w2 + 4 * S:off_w2 + 4 * S + Cmid, 0:Cmid]
    acc = jnp.dot(w2c, h1, preferred_element_type=jnp.float32)
    # Shifted taps (0,0),(0,1),(0,2),(1,0): pltpu.roll along lanes + wrap mask
    # (masks are pre-broadcast to Cmid rows in the slab -> no in-kernel
    # broadcast_in_dim is emitted).
    shifts = (W + 1, W, W - 1, 1)
    for t in range(4):
        w2t = p_ref[off_w2 + t * S:off_w2 + t * S + Cmid, 0:Cmid]
        mt = p_ref[off_m + t * S:off_m + t * S + Cmid, 0:HW]      # (Cmid, HW)
        tap = pltpu.roll(h1, shift=shifts[t], axis=1) * mt
        acc = acc + jnp.dot(w2t, tap, preferred_element_type=jnp.float32)
    b2 = p_ref[off_w2:off_w2 + Cmid, Cmid:Cmid + 1]               # (Cmid, 1)
    h2 = jnp.maximum(acc + b2, 0.0)                               # (Cmid, HW)

    # conv3: 1x1 + bias, then residual add; lane-dense store.
    w3 = p_ref[off_w3:off_w3 + C, 0:Cmid]                         # (C, Cmid)
    b3 = p_ref[off_w3:off_w3 + C, Cmid:Cmid + 1]                  # (C, 1)
    y = jnp.dot(w3, h2, preferred_element_type=jnp.float32) + b3
    out_ref[0] = (y + x).astype(out_ref.dtype)


def residual_masked_conv2d(x_nchw, params, layout):
    """x_nchw: (N, C, H, W) float32. Returns (N, C, H, W) float32."""
    N, C, H, W = x_nchw.shape
    HW = H * W
    xf = x_nchw.reshape(N, C, HW).astype(jnp.float32)   # free reshape only

    kernel = functools.partial(
        _residual_masked_conv_kernel,
        C=C, Cmid=layout["Cmid"], W=W, S=layout["S"],
        off_m=layout["off_m"], off_w1=layout["off_w1"],
        off_w2=layout["off_w2"], off_w3=layout["off_w3"])

    out = pl.pallas_call(
        kernel,
        out_shape=jax.ShapeDtypeStruct((N, C, HW), jnp.float32),
        grid=(N,),                                         # one image per step
        in_specs=[
            pl.BlockSpec((1, C, HW), lambda n: (n, 0, 0)),
            pl.BlockSpec(tuple(params.shape), lambda n: (0, 0)),  # resident
        ],
        out_specs=pl.BlockSpec((1, C, HW), lambda n: (n, 0, 0)),
        compiler_params=pltpu.CompilerParams(
            dimension_semantics=("parallel",)),            # 2 TCs on v7x
    )(xf, params)

    return out.reshape(N, C, H, W)                         # free reshape back


def make_params(key, input_dim, H, W):
    """Deterministic synthetic parameters (PyTorch Conv2d shapes) + packed slab."""
    C, Cmid, HW = input_dim, input_dim // 2, H * W
    ks = jax.random.split(key, 6)
    # PyTorch layout: weight (out, in, kH, kW), bias (out,)
    w1_t = 0.1 * jax.random.normal(ks[0], (Cmid, C, 1, 1), jnp.float32)
    b1_t = 0.1 * jax.random.normal(ks[1], (Cmid,), jnp.float32)
    w2_t = 0.1 * jax.random.normal(ks[2], (Cmid, Cmid, 3, 3), jnp.float32)
    b2_t = 0.1 * jax.random.normal(ks[3], (Cmid,), jnp.float32)
    w3_t = 0.1 * jax.random.normal(ks[4], (C, Cmid, 1, 1), jnp.float32)
    b3_t = 0.1 * jax.random.normal(ks[5], (C,), jnp.float32)

    # 'B' mask for k=3: zero center-row cols >= 2 and all rows below center.
    mask = np.ones((Cmid, Cmid, 3, 3), np.float32)
    mask[:, :, 1, 2:] = 0.0
    mask[:, :, 2:, :] = 0.0
    w2_t = w2_t * jnp.asarray(mask)

    raw = (w1_t, b1_t, w2_t, b2_t, w3_t, b3_t)

    # ---- Pack masks + weights + biases into ONE f32 slab (2 input DMAs). ----
    S = _round_up(Cmid, 8)                 # 8-aligned sublane stride per block
    off_m, off_w1 = 0, 4 * S
    off_w2 = off_w1 + S
    off_w3 = off_w2 + 5 * S
    rows = off_w3 + _round_up(C, 8)
    cols = max(HW, C + 1, Cmid + 1)
    P = np.zeros((rows, cols), np.float32)

    # Wrap masks for the rolled taps (horizontal wrap AND top-row wrap of the
    # roll), pre-broadcast to Cmid rows.
    h_idx = np.arange(HW) // W
    w_idx = np.arange(HW) % W
    tap_valid = (
        (h_idx >= 1) & (w_idx >= 1),        # tap (0,0): up-left
        (h_idx >= 1),                       # tap (0,1): up
        (h_idx >= 1) & (w_idx <= W - 2),    # tap (0,2): up-right
        (w_idx >= 1),                       # tap (1,0): left
    )
    for t, valid in enumerate(tap_valid):
        P[off_m + t * S:off_m + t * S + Cmid, :HW] = \
            valid.astype(np.float32)[None, :]

    w1n, w2n, w3n = (np.asarray(a) for a in (w1_t, w2_t, w3_t))
    P[off_w1:off_w1 + Cmid, :C] = w1n[:, :, 0, 0]
    P[off_w1:off_w1 + Cmid, C] = np.asarray(b1_t)
    for t, (kh, kw) in enumerate(_LIVE_TAPS):
        P[off_w2 + t * S:off_w2 + t * S + Cmid, :Cmid] = w2n[:, :, kh, kw]
    P[off_w2:off_w2 + Cmid, Cmid] = np.asarray(b2_t)
    P[off_w3:off_w3 + C, :Cmid] = w3n[:, :, 0, 0]
    P[off_w3:off_w3 + C, Cmid] = np.asarray(b3_t)

    layout = dict(Cmid=Cmid, S=S, off_m=off_m, off_w1=off_w1,
                  off_w2=off_w2, off_w3=off_w3)
    return jnp.asarray(P), layout, raw


def _reference(x, raw):
    """Pure-JAX NCHW reference matching the PyTorch forward."""
    w1, b1, w2, b2, w3, b3 = raw

    def conv(h, w, b, pad):
        y = jax.lax.conv_general_dilated(
            h, w, window_strides=(1, 1),
            padding=[(pad, pad), (pad, pad)],
            dimension_numbers=("NCHW", "OIHW", "NCHW"))
        return y + b[None, :, None, None]

    h = jax.nn.relu(conv(x, w1, b1, 0))
    h = jax.nn.relu(conv(h, w2, b2, 1))
    return conv(h, w3, b3, 0) + x


if __name__ == "__main__":
    key = jax.random.PRNGKey(0)
    kx, kp = jax.random.split(key)

    N, C, H, W = 2, 8, 16, 16          # input_dim = 8 -> hidden = 4, HW = 256
    x = jax.random.normal(kx, (N, C, H, W), jnp.float32)
    params, layout, raw_params = make_params(kp, C, H, W)

    out = residual_masked_conv2d(x, params, layout)
    out = jax.block_until_ready(out)

    ref = _reference(x, raw_params)
    np.testing.assert_allclose(np.asarray(out), np.asarray(ref),
                               rtol=1e-4, atol=1e-4)
    print("KERNEL_OK")
</pallas_src>

<mosaic_0001>
module attributes {stable_mosaic.version = 11 : i64} {
  func.func @_residual_masked_conv_kernel(%arg0: i32, %arg1: memref<1x8x256xf32, #tpu.memory_space<vmem>>, %arg2: memref<88x256xf32, #tpu.memory_space<vmem>>, %arg3: memref<1x8x256xf32, #tpu.memory_space<vmem>>) attributes {dimension_semantics = [#tpu.dimension_semantics<parallel>], iteration_bounds = array<i64: 2>, scalar_prefetch = 0 : i64, scratch_operands = 0 : i64, tpu.core_type = #tpu.core_type<tc>, window_params = [{transform_indices = @transform_0, window_bounds = array<i64: 1, 8, 256>}, {pipeline_mode = #tpu.pipeline_mode<synchronous>, transform_indices = @transform_1, window_bounds = array<i64: 88, 256>}, {transform_indices = @transform_2, window_bounds = array<i64: 1, 8, 256>}]} {
    %c0 = arith.constant 0 : index
    %c0_0 = arith.constant 0 : index
    %c0_1 = arith.constant 0 : index
    %0 = vector.load %arg1[%c0, %c0_0, %c0_1] : memref<1x8x256xf32, #tpu.memory_space<vmem>>, vector<1x8x256xf32>
    %1 = vector.shape_cast %0 : vector<1x8x256xf32> to vector<8x256xf32>
    %c32 = arith.constant 32 : index
    %c0_2 = arith.constant 0 : index
    %2 = vector.load %arg2[%c32, %c0_2] : memref<88x256xf32, #tpu.memory_space<vmem>>, vector<4x8xf32>
    %c32_3 = arith.constant 32 : index
    %c8 = arith.constant 8 : index
    %3 = vector.load %arg2[%c32_3, %c8] : memref<88x256xf32, #tpu.memory_space<vmem>>, vector<4x1xf32>
    %cst = arith.constant dense<0.000000e+00> : vector<4x256xf32>
    %4 = tpu.matmul %2, %1, %cst {dimension_numbers = #tpu.dot_dimension_numbers<[1], [0], [0], [1], [0, 0, 1, 1], [], []>} : vector<4x8xf32>, vector<8x256xf32>, vector<4x256xf32> -> vector<4x256xf32>
    %5 = vector.broadcast %3 : vector<4x1xf32> to vector<4x256xf32>
    %6 = arith.addf %4, %5 : vector<4x256xf32>
    %cst_4 = arith.constant 0.000000e+00 : f32
    %7 = vector.broadcast %cst_4 : f32 to vector<4x256xf32>
    %8 = arith.maximumf %6, %7 : vector<4x256xf32>
    %c72 = arith.constant 72 : index
    %c0_5 = arith.constant 0 : index
    %9 = vector.load %arg2[%c72, %c0_5] : memref<88x256xf32, #tpu.memory_space<vmem>>, vector<4x4xf32>
    %cst_6 = arith.constant dense<0.000000e+00> : vector<4x256xf32>
    %10 = tpu.matmul %9, %8, %cst_6 {dimension_numbers = #tpu.dot_dimension_numbers<[1], [0], [0], [1], [0, 0, 1, 1], [], []>} : vector<4x4xf32>, vector<4x256xf32>, vector<4x256xf32> -> vector<4x256xf32>
    %c40 = arith.constant 40 : index
    %c0_7 = arith.constant 0 : index
    %11 = vector.load %arg2[%c40, %c0_7] : memref<88x256xf32, #tpu.memory_space<vmem>>, vector<4x4xf32>
    %c0_8 = arith.constant 0 : index
    %c0_9 = arith.constant 0 : index
    %12 = vector.load %arg2[%c0_8, %c0_9] : memref<88x256xf32, #tpu.memory_space<vmem>>, vector<4x256xf32>
    %c17_i32 = arith.constant 17 : i32
    %13 = tpu.dynamic_rotate %8 by %c17_i32 dim 1 : vector<4x256xf32>, i32 -> vector<4x256xf32>
    %14 = arith.mulf %13, %12 : vector<4x256xf32>
    %cst_10 = arith.constant dense<0.000000e+00> : vector<4x256xf32>
    %15 = tpu.matmul %11, %14, %cst_10 {dimension_numbers = #tpu.dot_dimension_numbers<[1], [0], [0], [1], [0, 0, 1, 1], [], []>} : vector<4x4xf32>, vector<4x256xf32>, vector<4x256xf32> -> vector<4x256xf32>
    %16 = arith.addf %10, %15 : vector<4x256xf32>
    %c48 = arith.constant 48 : index
    %c0_11 = arith.constant 0 : index
    %17 = vector.load %arg2[%c48, %c0_11] : memref<88x256xf32, #tpu.memory_space<vmem>>, vector<4x4xf32>
    %c8_12 = arith.constant 8 : index
    %c0_13 = arith.constant 0 : index
    %18 = vector.load %arg2[%c8_12, %c0_13] : memref<88x256xf32, #tpu.memory_space<vmem>>, vector<4x256xf32>
    %c16_i32 = arith.constant 16 : i32
    %19 = tpu.dynamic_rotate %8 by %c16_i32 dim 1 : vector<4x256xf32>, i32 -> vector<4x256xf32>
    %20 = arith.mulf %19, %18 : vector<4x256xf32>
    %cst_14 = arith.constant dense<0.000000e+00> : vector<4x256xf32>
    %21 = tpu.matmul %17, %20, %cst_14 {dimension_numbers = #tpu.dot_dimension_numbers<[1], [0], [0], [1], [0, 0, 1, 1], [], []>} : vector<4x4xf32>, vector<4x256xf32>, vector<4x256xf32> -> vector<4x256xf32>
    %22 = arith.addf %16, %21 : vector<4x256xf32>
    %c56 = arith.constant 56 : index
    %c0_15 = arith.constant 0 : index
    %23 = vector.load %arg2[%c56, %c0_15] : memref<88x256xf32, #tpu.memory_space<vmem>>, vector<4x4xf32>
    %c16 = arith.constant 16 : index
    %c0_16 = arith.constant 0 : index
    %24 = vector.load %arg2[%c16, %c0_16] : memref<88x256xf32, #tpu.memory_space<vmem>>, vector<4x256xf32>
    %c15_i32 = arith.constant 15 : i32
    %25 = tpu.dynamic_rotate %8 by %c15_i32 dim 1 : vector<4x256xf32>, i32 -> vector<4x256xf32>
    %26 = arith.mulf %25, %24 : vector<4x256xf32>
    %cst_17 = arith.constant dense<0.000000e+00> : vector<4x256xf32>
    %27 = tpu.matmul %23, %26, %cst_17 {dimension_numbers = #tpu.dot_dimension_numbers<[1], [0], [0], [1], [0, 0, 1, 1], [], []>} : vector<4x4xf32>, vector<4x256xf32>, vector<4x256xf32> -> vector<4x256xf32>
    %28 = arith.addf %22, %27 : vector<4x256xf32>
    %c64 = arith.constant 64 : index
    %c0_18 = arith.constant 0 : index
    %29 = vector.load %arg2[%c64, %c0_18] : memref<88x256xf32, #tpu.memory_space<vmem>>, vector<4x4xf32>
    %c24 = arith.constant 24 : index
    %c0_19 = arith.constant 0 : index
    %30 = vector.load %arg2[%c24, %c0_19] : memref<88x256xf32, #tpu.memory_space<vmem>>, vector<4x256xf32>
    %c1_i32 = arith.constant 1 : i32
    %31 = tpu.dynamic_rotate %8 by %c1_i32 dim 1 : vector<4x256xf32>, i32 -> vector<4x256xf32>
    %32 = arith.mulf %31, %30 : vector<4x256xf32>
    %cst_20 = arith.constant dense<0.000000e+00> : vector<4x256xf32>
    %33 = tpu.matmul %29, %32, %cst_20 {dimension_numbers = #tpu.dot_dimension_numbers<[1], [0], [0], [1], [0, 0, 1, 1], [], []>} : vector<4x4xf32>, vector<4x256xf32>, vector<4x256xf32> -> vector<4x256xf32>
    %34 = arith.addf %28, %33 : vector<4x256xf32>
    %c40_21 = arith.constant 40 : index
    %c4 = arith.constant 4 : index
    %35 = vector.load %arg2[%c40_21, %c4] : memref<88x256xf32, #tpu.memory_space<vmem>>, vector<4x1xf32>
    %36 = vector.broadcast %35 : vector<4x1xf32> to vector<4x256xf32>
    %37 = arith.addf %34, %36 : vector<4x256xf32>
    %cst_22 = arith.constant 0.000000e+00 : f32
    %38 = vector.broadcast %cst_22 : f32 to vector<4x256xf32>
    %39 = arith.maximumf %37, %38 : vector<4x256xf32>
    %c80 = arith.constant 80 : index
    %c0_23 = arith.constant 0 : index
    %40 = vector.load %arg2[%c80, %c0_23] : memref<88x256xf32, #tpu.memory_space<vmem>>, vector<8x4xf32>
    %c80_24 = arith.constant 80 : index
    %c4_25 = arith.constant 4 : index
    %41 = vector.load %arg2[%c80_24, %c4_25] : memref<88x256xf32, #tpu.memory_space<vmem>>, vector<8x1xf32>
    %cst_26 = arith.constant dense<0.000000e+00> : vector<8x256xf32>
    %42 = tpu.matmul %40, %39, %cst_26 {dimension_numbers = #tpu.dot_dimension_numbers<[1], [0], [0], [1], [0, 0, 1, 1], [], []>} : vector<8x4xf32>, vector<4x256xf32>, vector<8x256xf32> -> vector<8x256xf32>
    %43 = vector.broadcast %41 : vector<8x1xf32> to vector<8x256xf32>
    %44 = arith.addf %42, %43 : vector<8x256xf32>
    %45 = arith.addf %44, %1 : vector<8x256xf32>
    %c0_27 = arith.constant 0 : index
    %c0_28 = arith.constant 0 : index
    %c0_29 = arith.constant 0 : index
    %46 = vector.load %arg3[%c0_27, %c0_28, %c0_29] : memref<1x8x256xf32, #tpu.memory_space<vmem>>, vector<1x8x256xf32>
    %47 = vector.shape_cast %46 : vector<1x8x256xf32> to vector<8x256xf32>
    %48 = vector.shape_cast %45 : vector<8x256xf32> to vector<1x8x256xf32>
    tpu.vector_store %arg3[%c0_27, %c0_28, %c0_29], %48 {strides = array<i32>} : memref<1x8x256xf32, #tpu.memory_space<vmem>>, vector<1x8x256xf32>,
    return
  }
  func.func @transform_0(%arg0: i32) -> (i32, i32, i32) {
    %c0_i32 = arith.constant 0 : i32
    %c0_i32_0 = arith.constant 0 : i32
    %c0_i32_1 = arith.constant 0 : i32
    return %arg0, %c0_i32, %c0_i32_0 : i32, i32, i32
  }
  func.func @transform_1(%arg0: i32) -> (i32, i32) {
    %c0_i32 = arith.constant 0 : i32
    %c0_i32_0 = arith.constant 0 : i32
    %c0_i32_1 = arith.constant 0 : i32
    return %c0_i32, %c0_i32_0 : i32, i32
  }
  func.func @transform_2(%arg0: i32) -> (i32, i32, i32) {
    %c0_i32 = arith.constant 0 : i32
    %c0_i32_0 = arith.constant 0 : i32
    %c0_i32_1 = arith.constant 0 : i32
    return %arg0, %c0_i32, %c0_i32_0 : i32, i32, i32
  }
}

</mosaic_0001>

<bundles_post_ra>
// kernel: tpu_custom_call.1
= control target key start
LH: loop header
LB: loop body
LE: loop exit
PB: predicated region body
PF: predicated region fallthrough
CT: control target
= control target key end

     0   :  { %7 = vsyncpa [#allocation3], 0  ;;  %s1358_s0 = inlined_call_operand.hbm [shape: f32[2,8,256], index: 0, kind: input, shape index: {}]   ;;  %s1359_s1 = inlined_call_operand.hbm [shape: f32[88,256], index: 1, kind: input, shape index: {}]   ;;  %s1360_s2 = inlined_call_operand.hbm [shape: f32[2,8,256], index: 2, kind: output, shape index: {}]  }
   0x1   :  { %9 = vsyncpa [#allocation3 + $0x1], 0 }
   0x2   :  { %10 = vsyncpa [#allocation6], 0 }
   0x3   :  { %11 = vsyncpa [#allocation4], 0 }
   0x4   :  { %13 = vsyncpa [#allocation4 + $0x1], 0  ;;  %s1167_s9 = smov 0   ;;  %s1169_s10 = smov 0  }
   0x5   :  { %s1171_s11 = smov 0   ;;  %s1173_s12 = smov 0  }
   0x6 LB: > { %s1188_s13 = sadd.s32 4294967295, %s1138_s12   ;;  %s910_s14 = sadd.s32 4294967294, %s1138_s12   ;;  %s1138_s12 = sphi %s1173_s12, %s1382_s12   ;;  %s1134_s11 = sphi %s1171_s11, %s1381_s11   ;;  %s1130_s10 = sphi %s1169_s10, %s1380_s10   ;;  %s1126_s9 = sphi %s1167_s9, %s1379_s9  }
   0x7   : > { %p39_p0 = scmp.ne.s32.totalorder %s1130_s10, %s1126_s9  ;;  %p1361_p1 = scmp.eq.s32.totalorder %s1188_s13, 0 }
   0x8   : > { %p90_p3 = scmp.eq.s32.totalorder %s910_s14, 1  ;;  %p911_p5 = scmp.ge.s32.totalorder %s1138_s12, 1 }
   0x9   : > { %p1197_p4 = por %p1361_p1, %p39_p0  ;;  %p97_p7 = scmp.lt.s32.totalorder %s1138_s12, 3 }
   0xa   : > { %p1202_p6 = por %p90_p3, %p39_p0  ;;  %s1140_s18 = smov [#allocation5]  }
   0xb   : > { %s1365_s15 = scalar_select %p1197_p4, 1, 0 }
   0xc   : > { %s1366_s16 = scalar_select %p1202_p6, 1, 0 }
   0xd   : > { %p1207_p8 = pnand %p911_p5, %p97_p7  ;;  %s109_s19 = sshll.u32 %s1140_s18, 4  ;;  %s110_s19 = int_to_ptr.vmem [resolvable:$true] %s109_s19 }
   0xe   : > { %s1221_s21 = sadd.s32 1, %s1138_s12   ;;  %s26_s22 = sadd.s32 1, %s1134_s11 }
   0xf   : > { %s1367_s17 = scalar_select %p1207_p8, 1, 0 }
  0x10   : > { %p955_p9 = pneg %p1207_p8  ;;  %s23_s23 = ssub.s32 %s1138_s12, %s1221_s21 }
  0x11   : > { %s1027_s24 = scalar_lea.vmem %s110_s19, 2816  ;;  %p1035_p5 = scmp.lt.s32.totalorder %s110_s19, %s110_s19 }
  0x12   : > { %p1216_p11 = pnand %p955_p9, %p1361_p1  ;;  %p1028_p13 = scmp.ne.s32.totalorder %s110_s19, %s1027_s24 }
  0x13   : > { %p1036_p7 = scmp.lt.s32.totalorder %s1027_s24, %s1027_s24 }
  0x14   : > { %p1018_p12 = pneg %p1216_p11 }
  0x15   : > { %p1037_p10 = por %p1036_p7, %p1035_p5 }
  0x16   : > { %p1030_p0 = pnand %p1028_p13, %p1018_p12 }
  0x18   : > { %p1031_p3 = pneg %p1030_p0 }
  0x1a   : > { %p1038_p2 = pnand %p1037_p10, %p1031_p3 }
  0x1c   : > { %1041 = shalt.err (!%p1038_p2)
}
  0x1d   : > { %s1141_s25 = smov 256   ;;  %s1142_s26 = smov 16  }
  0x1e   : > { %958 = dma.hbm_to_vmem [thread:$0]  (!%p1216_p11), %s1359_s1, 2816, %s110_s19, [#allocation6], %s1141_s25, %s1141_s25, %s1142_s26  }
  0x1f   : > { %p24_p9 = scmp.eq.s32.totalorder %s23_s23, 0  ;;  %p33_p12 = scmp.ne.s32.totalorder %s1134_s11, %s1130_s10 }
  0x20   : > { %p34_p10 = scmp.eq.s32.totalorder %s1138_s12, 0  ;;  %p968_p2 = scmp.lt.s32.totalorder %s1138_s12, 2 }
  0x21   : > { %s1238_s29 = scalar_select %p24_p9, %s1134_s11, %s26_s22  }
  0x22   : > { %p35_p13 = por %p34_p10, %p33_p12  ;;  %p1369_p0 = scmp.eq.s32.totalorder %s1188_s13, 1 }
  0x23   : > { %s123_s3 = sand.u32 1, %s1134_s11   ;;  %s945_s4 = sshll.u32 %s1138_s12, 8 }
  0x24   : > { %p1242_p3 = por %p1369_p0, %p33_p12  ;;  %s914_s5 = sshll.u32 %s123_s3, 4 }
  0x25   : > { %s1251_s8 = scalar_lea.hbm %s1358_s0, %s945_s4  ;;  %s127_s14 = scalar_lea.vmem [#allocation2], %s914_s5 }
  0x26   : > { %s1370_s30 = scalar_select %p1242_p3, 1, 0 }
  0x27   : > { %s135_s18 = sshll.u32 %s127_s14, 4  ;;  %p1253_p11 = pnand %p968_p2, %p35_p13  ;;  %s136_s18 = int_to_ptr.vmem [resolvable:$true] %s135_s18 }
  0x28   : > { %s124_s20 = scalar_lea.sflag [#allocation3], %s123_s3  ;;  %s1042_s22 = scalar_lea.hbm %s1251_s8, 256 }
  0x29   : > { %p1043_p5 = scmp.ne.s32.totalorder %s1251_s8, %s1042_s22  ;;  %p1044_p7 = pneg %p1253_p11 }
  0x2a   : > { %s1047_s25 = scalar_lea.hbm %s1358_s0, 512  ;;  %p1048_p10 = scmp.lt.s32.totalorder %s1251_s8, %s1358_s0 }
  0x2b   : > { %p1045_p9 = pnand %p1044_p7, %p1043_p5  ;;  %p1049_p2 = scmp.lt.s32.totalorder %s1047_s25, %s1042_s22 }
  0x2d   : > { %p1046_p12 = pneg %p1045_p9  ;;  %p1050_p13 = por %p1049_p2, %p1048_p10 }
  0x2f   : > { %p1051_p0 = pnand %p1050_p13, %p1046_p12 }
  0x31   : > { %1054 = shalt.err (!%p1051_p0)
}
  0x32   : > { %s1055_s28 = scalar_lea.vmem %s136_s18, 256  ;;  %s1143_s3 = smov [#allocation2]  }
  0x33   : > { %p1056_p1 = scmp.ne.s32.totalorder %s136_s18, %s1055_s28  ;;  %s1060_s4 = sshll.u32 %s1143_s3, 4  ;;  %s1061_s4 = int_to_ptr.vmem [resolvable:$false] %s1060_s4 }
  0x34   : > { %s1062_s5 = scalar_lea.vmem %s1061_s4, 512  ;;  %p1063_p5 = scmp.lt.s32.totalorder %s136_s18, %s1061_s4 }
  0x35   : > { %p1058_p6 = pnand %p1056_p1, %p1044_p7  ;;  %p1064_p9 = scmp.lt.s32.totalorder %s1062_s5, %s1055_s28 }
  0x37   : > { %p1059_p3 = pneg %p1058_p6  ;;  %p1065_p4 = por %p1064_p9, %p1063_p5 }
  0x39   : > { %p1066_p8 = pnand %p1065_p4, %p1059_p3 }
  0x3b   : > { %1069 = shalt.err (!%p1066_p8)
}
  0x3c   : > { %962 = dma.hbm_to_vmem [thread:$0]  (!%p1253_p11), %s1251_s8, 256, %s136_s18, %s124_s20  }
  0x3d   : > { %p1372_p12 = scmp.ne.s32.totalorder %s1367_s17, 0 }
  0x3e   : > { %s1274_s6 = sand.u32 (!%p1372_p12), 1, %s1130_s10   ;;  %p1373_p1 = scmp.ne.s32.totalorder (!%p1372_p12), %s1365_s15, 0 }
  0x3f   : > { %144 = sbr.rel (%p1372_p12) target bundleno = 820 (0x334), region = 28  ;;  %s918_s7 = sshll.u32 (!%p1372_p12), %s1274_s6, 4 }
  0x40   : > { %s147_s14 = scalar_lea.sflag (!%p1372_p12), [#allocation3], %s1274_s6  ;;  %s150_s22 = scalar_lea.vmem (!%p1372_p12), [#allocation2], %s918_s7 }
  0x44   : > { %1113 = dma.done.wait (%p1373_p1), %s147_s14, 256  }
  0x45   : > { %1115 = vsyncadd (%p1373_p1), %s147_s14, 4294967040  ;;  %p1374_p4 = scmp.eq.s32.totalorder %s1188_s13, 0 }
  0x47   : > { %1117 = dma.done.wait (%p1374_p4), [#allocation6], 2816   ;;  %p1375_p6 = pmov %p1374_p4 }
  0x48   : > { %v1144_v0 = vmov 0.0   ;;  %v1145_v1 = vmov 8   ;;  %v1290_v2 = vld [vmem:[%s150_s22 + $0x8] sm:$0xff]  ;;  %v1292_v3 = vld [vmem:[%s150_s22] sm:$0xff]  ;;  %vm183_vm0 = vcmask 64512   ;;  %vm278_vm1 = vcmask 1043456  }
  0x49   : > { %1119 = vsyncadd (%p1375_p6), [#allocation6], 4294964480  ;;  %250 = vmatprep.mubr.f32.mxu0 %v1144_v0  ;;  %1013 = vset.pattern.permute.xlu0 %v1145_v1  ;;  %v177_v4 = vld [vmem:[#allocation5 + $0x40] sm:$0xf]  ;;  %s1146_s15 = smov 16   ;;  %s1147_s17 = smov 17   ;;  %v267_v15 = vlaneseq }
  0x4a   : > { %349 = vmatprep.mubr.f32.mxu1 %v1144_v0  ;;  %216 = vmatprep.subr.mxu0 %v1290_v2  ;;  %vm274_vm2 = vcmask 31744   ;;  %v259_v12 = vld [vmem:[#allocation5 + $0x90] sm:$0xf]  ;;  %v1148_v13 = vmov 4   ;;  %s1149_s8 = smov 15   ;;  %s1150_s18 = smov 1  }
  0x4b   : > { %180 = vperm.xlu0 %1013, %v177_v4   ;;  %217 = vmatpush1.msra.mxu0 %v1292_v3  ;;  %v260_v14 = vld [vmem:[#allocation5 + $0x50] sm:$0xf]  ;;  %v268_v16 = vand.u32 127, %v267_v15  ;;  %v261_v19 = vld [vmem:[#allocation5] sm:$0xf]  ;;  %s946_s19 = sshll.u32 %s1188_s13, 8 }
  0x4c   : > { %921 = vmatmul.mubr.msk.f32.vlgmr.msra.gmra.mxu0 %vm183_vm0, %v177_v4  ;;  %1014 = vset.pattern.permute.xlu1 %v1148_v13  ;;  %v262_v20 = vld [vmem:[#allocation5 + $0x8] sm:$0xf]  ;;  %v438_v25 = vld [vmem:[#allocation5 + $0x18] sm:$0xf]  ;;  %v437_v28 = vld [vmem:[#allocation5 + $0x10] sm:$0xf]  ;;  %s828_s26 = scalar_lea.hbm %s1360_s2, %s946_s19 }
  0x4d   : > { %429 = vmatprep.mubr.f32.mxu0 %v1144_v0  ;;  %vm269_vm3 = vcmp.lt.s32.totalorder %v268_v16, 17  ;;  %vm443_vm4 = vcmp.lt.s32.totalorder %v268_v16, 16  ;;  %vm537_vm5 = vcmp.lt.s32.totalorder %v268_v16, 15  ;;  %v531_v31 = vld [vmem:[#allocation5 + $0x20] sm:$0xf]  ;;  %vm631_vm6 = vcmp.lt.s32.totalorder %v268_v16, 1 }
  0x4e   : > { %v532_v32 = vld [vmem:[#allocation5 + $0x28] sm:$0xf]  ;;  %v625_v41 = vld [vmem:[#allocation5 + $0x30] sm:$0xf]  ;;  %v626_v42 = vld [vmem:[#allocation5 + $0x38] sm:$0xf] }
  0x4f   : > { %1015 = vset.pattern.permute.xlu0 %v1148_v13  ;;  %v436_v43 = vld [vmem:[#allocation5 + $0x60] sm:$0xf]  ;;  %v530_v44 = vld [vmem:[#allocation5 + $0x70] sm:$0xf]  ;;  %s174_s20 = scalar_lea.vmem [#allocation7], %s918_s7  ;;  %s816_s27 = scalar_lea.sflag [#allocation4], %s1274_s6 }
  0x50   : > { %v624_v51 = vld [vmem:[#allocation5 + $0x80] sm:$0xf]  ;;  %s830_s23 = sshll.u32 %s174_s20, 4  ;;  %p1376_p3 = scmp.ne.s32.totalorder %s1370_s30, 0  ;;  %s831_s23 = int_to_ptr.vmem [resolvable:$true] %s830_s23 }
  0x51   : > { %v726_v52 = vld [vmem:[#allocation5 + $0xa0] sm:$0xff]  ;;  %s1070_s28 = scalar_lea.vmem %s831_s23, 256  ;;  %s1151_s13 = smov [#allocation7]  }
  0x52   : > { %p1071_p8 = scmp.ne.s32.totalorder %s831_s23, %s1070_s28  ;;  %s1074_s3 = sshll.u32 %s1151_s13, 4  ;;  %s1075_s3 = int_to_ptr.vmem [resolvable:$false] %s1074_s3 }
  0x53   : > { %s1076_s4 = scalar_lea.vmem %s1075_s3, 512  ;;  %p1077_p10 = scmp.lt.s32.totalorder %s831_s23, %s1075_s3 }
  0x54   : > { %p1072_p11 = pnand %p1071_p8, %p1376_p3  ;;  %p1078_p2 = scmp.lt.s32.totalorder %s1076_s4, %s1070_s28 }
  0x56   : > { %p1073_p7 = pneg %p1072_p11  ;;  %p1079_p13 = por %p1078_p2, %p1077_p10 }
  0x58   : > { %p1080_p0 = pnand %p1079_p13, %p1073_p7 }
  0xc6   : > { %v181_v5 = vpop.permute.xlu0 %180 }
 0x10c   : > { %v252_v6 = vpop.f32.mrf.mxu0 }
 0x10d   : > { %v253_v7 = vadd.f32 %v252_v6, %v181_v5 }
 0x10e   : > { %v254_v8 = vpop.f32.mrf.mxu0 }
 0x10f   : > { %v257_v9 = vmax.f32 %v253_v7, 0.0  ;;  %v255_v10 = vadd.f32 %v254_v8, %v181_v5 }
 0x111   : > { %v258_v11 = vmax.f32 %v255_v10, 0.0  ;;  %439 = vrot.lane.b32.xlu1 %v257_v9, %s1146_s15  ;;  %263 = vrot.lane.b32.xlu0 %v257_v9, %s1147_s17 }
 0x113   : > { %925 = vmatprep.subr.msk.mxu0 %vm278_vm1, %v258_v11 }
 0x114   : > { %926 = vmatpush1.msk.msra.mxu0 %vm278_vm1, %v257_v9 }
 0x115   : > { %265 = vrot.lane.b32.xlu1 %v258_v11, %s1147_s17  ;;  %441 = vrot.lane.b32.xlu0 %v258_v11, %s1146_s15 }
 0x116   : > { %927 = vmatmul.mubr.msk.f32.vlgmr.msra.gmra.mxu0 %vm274_vm2, %v259_v12 }
 0x117   : > { %615 = vmatprep.mubr.f32.mxu0 %v1144_v0 }
 0x119   : > { %533 = vrot.lane.b32.xlu1 %v257_v9, %s1149_s8  ;;  %535 = vrot.lane.b32.xlu0 %v258_v11, %s1149_s8 }
 0x11d   : > { %627 = vrot.lane.b32.xlu1 %v257_v9, %s1150_s18  ;;  %629 = vrot.lane.b32.xlu0 %v258_v11, %s1150_s18 }
 0x121   : > { %719 = vperm.xlu1 %1014, %v260_v14   ;;  %729 = vperm.xlu0 %1015, %v726_v52  }
 0x183   : > { %v440_v17 = vpop.permute.xlu1 %439  ;;  %v264_v18 = vpop.permute.xlu0 %263 }
 0x187   : > { %v266_v21 = vpop.permute.xlu1 %265  ;;  %v442_v22 = vpop.permute.xlu0 %441 }
 0x188   : > { %v270_v23 = vsel %vm269_vm3, %v264_v18, %v266_v21  ;;  %v271_v24 = vsel %vm269_vm3, %v266_v21, %v264_v18  ;;  %v444_v26 = vsel %vm443_vm4, %v440_v17, %v442_v22  ;;  %v445_v29 = vsel %vm443_vm4, %v442_v22, %v440_v17 }
 0x189   : > { %v272_v27 = vmul.f32 %v271_v24, %v261_v19  ;;  %v273_v30 = vmul.f32 %v270_v23, %v262_v20  ;;  %v447_v33 = vmul.f32 %v444_v26, %v438_v25  ;;  %v446_v36 = vmul.f32 %v445_v29, %v437_v28 }
 0x18b   : > { %v534_v34 = vpop.permute.xlu1 %533  ;;  %922 = vmatprep.subr.msk.mxu1 %vm278_vm1, %v273_v30  ;;  %v536_v35 = vpop.permute.xlu0 %535 }
 0x18c   : > { %v538_v37 = vsel %vm537_vm5, %v534_v34, %v536_v35  ;;  %v539_v38 = vsel %vm537_vm5, %v536_v35, %v534_v34  ;;  %923 = vmatpush1.msk.msra.mxu1 %vm278_vm1, %v272_v27 }
 0x18d   : > { %v540_v39 = vmul.f32 %v539_v38, %v531_v31  ;;  %v541_v40 = vmul.f32 %v538_v37, %v532_v32  ;;  %924 = vmatmul.mubr.msk.f32.vlgmr.msra.gmra.mxu1 %vm274_vm2, %v260_v14  ;;  %928 = vmatprep.subr.msk.mxu1 %vm278_vm1, %v447_v33 }
 0x18e   : > { %929 = vmatpush1.msk.msra.mxu1 %vm278_vm1, %v446_v36  ;;  %521 = vmatprep.mubr.f32.mxu1 %v1144_v0 }
 0x18f   : > { %v628_v45 = vpop.permute.xlu1 %627  ;;  %v630_v46 = vpop.permute.xlu0 %629  ;;  %931 = vmatprep.subr.msk.mxu0 %vm278_vm1, %v541_v40 }
 0x190   : > { %v632_v47 = vsel %vm631_vm6, %v628_v45, %v630_v46  ;;  %v633_v48 = vsel %vm631_vm6, %v630_v46, %v628_v45  ;;  %932 = vmatpush1.msk.msra.mxu0 %vm278_vm1, %v540_v39 }
 0x191   : > { %v634_v49 = vmul.f32 %v633_v48, %v625_v41  ;;  %v635_v50 = vmul.f32 %v632_v47, %v626_v42  ;;  %930 = vmatmul.mubr.msk.f32.vlgmr.msra.gmra.mxu1 %vm274_vm2, %v436_v43  ;;  %933 = vmatmul.mubr.msk.f32.vlgmr.msra.gmra.mxu0 %vm274_vm2, %v530_v44 }
 0x192   : > { %709 = vmatprep.mubr.f32.mxu1 %v1144_v0  ;;  %804 = vmatprep.mubr.f32.mxu0 %v1144_v0 }
 0x193   : > { %934 = vmatprep.subr.msk.mxu1 %vm278_vm1, %v635_v50 }
 0x194   : > { %935 = vmatpush1.msk.msra.mxu1 %vm278_vm1, %v634_v49 }
 0x195   : > { %936 = vmatmul.mubr.msk.f32.vlgmr.msra.gmra.mxu1 %vm274_vm2, %v624_v51 }
 0x19c   : > { %v720_v7 = vpop.permute.xlu1 %719  ;;  %v730_v14 = vpop.permute.xlu0 %729 }
 0x1d6   : > { %v431_v53 = vpop.f32.mrf.mxu0 }
 0x1d8   : > { %v433_v55 = vpop.f32.mrf.mxu0 }
 0x24d   : > { %v351_v54 = vpop.f32.mrf.mxu1 }
 0x24e   : > { %v432_v57 = vadd.f32 %v431_v53, %v351_v54 }
 0x24f   : > { %v353_v56 = vpop.f32.mrf.mxu1 }
 0x250   : > { %v434_v60 = vadd.f32 %v433_v55, %v353_v56 }
 0x251   : > { %v523_v58 = vpop.f32.mrf.mxu1  ;;  %v617_v59 = vpop.f32.mrf.mxu0 }
 0x252   : > { %v528_v61 = vadd.f32 %v523_v58, %v432_v57 }
 0x253   : > { %v525_v62 = vpop.f32.mrf.mxu1  ;;  %v619_v1 = vpop.f32.mrf.mxu0 }
 0x254   : > { %v622_v63 = vadd.f32 %v617_v59, %v528_v61  ;;  %v529_v0 = vadd.f32 %v525_v62, %v434_v60 }
 0x255   : > { %v711_v4 = vpop.f32.mrf.mxu1 }
 0x256   : > { %v623_v5 = vadd.f32 %v619_v1, %v529_v0  ;;  %v716_v6 = vadd.f32 %v711_v4, %v622_v63 }
 0x257   : > { %v713_v8 = vpop.f32.mrf.mxu1 }
 0x258   : > { %v717_v9 = vadd.f32 %v713_v8, %v623_v5  ;;  %v722_v10 = vadd.f32 %v720_v7, %v716_v6 }
 0x25a   : > { %v723_v11 = vadd.f32 %v720_v7, %v717_v9  ;;  %v724_v13 = vmax.f32 %v722_v10, 0.0 }
 0x25c   : > { %v725_v12 = vmax.f32 %v723_v11, 0.0 }
 0x25e   : > { %937 = vmatprep.subr.msk.mxu0 %vm278_vm1, %v725_v12 }
 0x25f   : > { %938 = vmatpush1.msk.msra.mxu0 %vm278_vm1, %v724_v13 }
 0x260   : > { %939 = vmatmul.mubr.msk.f32.vlgmr.msra.gmra.mxu0 %vm274_vm2, %v726_v52 }
 0x320   : > { %v806_v15 = vpop.f32.mrf.mxu0 }
 0x321   : > { %v807_v16 = vadd.f32 %v806_v15, %v730_v14 }
 0x322   : > { %v808_v17 = vpop.f32.mrf.mxu0 }
 0x323   : > { %v811_v18 = vadd.f32 %v807_v16, %v1292_v3  ;;  %v809_v19 = vadd.f32 %v808_v17, %v730_v14 }
 0x325   : > { %813 = vst [vmem:[%s174_s20] sm:$0xff] %v811_v18  ;;  %v812_v20 = vadd.f32 %v809_v19, %v1290_v2 }
 0x327   : > { %814 = vst [vmem:[%s174_s20 + $0x8] sm:$0xff] %v812_v20 }
 0x328   : > { %1083 = shalt.err (!%p1080_p0)
}
 0x329   : > { %s1084_s5 = scalar_lea.hbm %s828_s26, 256  ;;  %s1088_s14 = scalar_lea.hbm %s1360_s2, 512 }
 0x32a   : > { %p1085_p5 = scmp.ne.s32.totalorder %s828_s26, %s1084_s5  ;;  %p1089_p1 = scmp.lt.s32.totalorder %s828_s26, %s1360_s2 }
 0x32b   : > { %p1090_p4 = scmp.lt.s32.totalorder %s1088_s14, %s1084_s5 }
 0x32c   : > { %p1086_p9 = pnand %p1085_p5, %p1376_p3 }
 0x32d   : > { %p1091_p6 = por %p1090_p4, %p1089_p1 }
 0x32e   : > { %p1087_p12 = pneg %p1086_p9 }
 0x330   : > { %p1092_p8 = pnand %p1091_p6, %p1087_p12 }
 0x332   : > { %1095 = shalt.err (!%p1092_p8)
}
 0x333   : > { %953 = dma.vmem_to_hbm [thread:$0]  (%p1376_p3), %s831_s23, 256, %s828_s26, %s816_s27  }
 0x334 PF: > { %s842_s17 = sand.u32 1, %s1126_s9   ;;  %p1377_p11 = scmp.ne.s32.totalorder %s1366_s16, 0 }
 0x335   : > { %p1378_p7 = scmp.ge.s32.totalorder %s1138_s12, 2  ;;  %s843_s8 = scalar_lea.sflag [#allocation4], %s842_s17 }
 0x337   : > { %p964_p10 = pnand %p1378_p7, %p1377_p11 }
 0x339   : > { %p965_p2 = pneg %p964_p10 }
 0x33b   : > { %1121 = dma.done.wait (%p965_p2), %s843_s8, 256  }
 0x33c   : > { %1123 = vsyncadd (%p965_p2), %s843_s8, 4294967040  ;;  %p16_p13 = scmp.ge.s32.totalorder %s1221_s21, 4   ;;  %s1379_s9 = smov %s1130_s10 }
 0x33d   : > { %s1380_s10 = smov %s1134_s11  ;;  %s1381_s11 = smov %s1238_s29 }
 0x33e   : > { %s1382_s12 = smov %s1221_s21  ;;  %18 = sbr.rel (!%p16_p13) target bundleno = 6 (0x6), region = 77 }
 0x343   :  { %848 = vsyncpa [#allocation3], 1 }
 0x344   :  { %850 = vsyncpa [#allocation3 + $0x1], 1 }
 0x345   :  { %851 = vsyncpa [#allocation6], 1 }
 0x346   :  { %852 = vsyncpa [#allocation4], 1 }
 0x347   :  { %854 = vsyncpa [#allocation4 + $0x1], 1 }

</bundles_post_ra>
